<compile_context>
chip_gen: v6e
topology: v6e:2x2x1
jax: 0.10.0
libtpu: 0.0.40
codegen_flags: <defaults>
</compile_context>

<pallas_src>
import functools

import jax
import jax.numpy as jnp
from jax import lax
from jax.experimental import pallas as pl
from jax.experimental.pallas import tpu as pltpu

LANES = 128
TM_MAX = 8192            # 8192 rows * 128 lanes * 4 B = 4 MiB per f32 block
SINGLE_BLOCK_ROWS = 1024  # below this, per-step overhead dominates; use 1 block
VMEM_LIMIT_BYTES = 40 << 20


def _cdiv(a, b):
    return -(-a // b)


def _round_up(a, b):
    return _cdiv(a, b) * b


def _pick_tiling(rows):
    """Choose (tm, num_blocks). Multi-block tm is a multiple of 8; block count
    is even (>=2) so v7x's two TensorCores stay balanced."""
    if rows <= SINGLE_BLOCK_ROWS:
        return rows, 1  # full-array block; tm == full dim so (8,128) rule holds
    nb = max(2, _cdiv(rows, TM_MAX))
    if nb % 2:
        nb += 1
    tm = _round_up(_cdiv(rows, nb), 8)
    nb = _cdiv(rows, tm)
    return tm, nb


def _dice_partial_kernel(x_ref, t_ref, out_ref, *, rows_valid_last, mask_last):
    """Per-block lane-resident partial sums.

    out_ref block is (1, 2, LANES): row 0 = sum(sigmoid(x) * t) over sublanes,
    row 1 = sum(sigmoid(x)) + sum(t). Cross-lane reduce + dice formula happen
    on the tiny partials outside the kernel.
    """

    def compute(masked):
        x = x_ref[...].astype(jnp.float32)
        t = t_ref[...].astype(jnp.float32)
        s = jax.nn.sigmoid(x)
        if masked:
            # Only the last block can have garbage rows beyond the array; a
            # single row-iota compare against a *static* threshold masks them.
            row = lax.broadcasted_iota(jnp.int32, x.shape, 0)
            valid = row < rows_valid_last
            s = jnp.where(valid, s, 0.0)
            t = jnp.where(valid, t, 0.0)
        inter = jnp.sum(s * t, axis=0, keepdims=True)                  # (1, L)
        total = (jnp.sum(s, axis=0, keepdims=True)
                 + jnp.sum(t, axis=0, keepdims=True))                  # (1, L)
        out_ref[0, 0:1, :] = inter
        out_ref[0, 1:2, :] = total

    if not mask_last:  # static: no partial last block -> no mask anywhere
        compute(False)
    else:
        last = pl.num_programs(0) - 1

        @pl.when(pl.program_id(0) != last)
        def _():
            compute(False)

        @pl.when(pl.program_id(0) == last)
        def _():
            compute(True)


def dice_score(inputs, targets, smooth=1.0):
    """Pallas equivalent of DiceScore.forward. Returns a scalar float32."""
    x = inputs.reshape(-1)
    t = targets.reshape(-1)
    n = x.shape[0]

    rem = n % LANES
    n_main = n - rem

    inter = jnp.float32(0.0)
    total = jnp.float32(0.0)

    if n_main:
        rows = n_main // LANES
        tm, nb = _pick_tiling(rows)
        mask_last = (nb * tm) != rows
        rows_valid_last = rows - (nb - 1) * tm  # static Python int

        x_main = x[:n_main] if rem else x
        t_main = t[:n_main] if rem else t
        x2 = x_main.reshape(rows, LANES)
        t2 = t_main.reshape(rows, LANES)

        kernel = functools.partial(
            _dice_partial_kernel,
            rows_valid_last=rows_valid_last,
            mask_last=mask_last)

        bytes_accessed = (n_main * (x2.dtype.itemsize + t2.dtype.itemsize)
                          + nb * 2 * LANES * 4)
        cost = pl.CostEstimate(flops=5 * n_main,
                               transcendentals=n_main,
                               bytes_accessed=bytes_accessed)

        partials = pl.pallas_call(
            kernel,
            out_shape=jax.ShapeDtypeStruct((nb, 2, LANES), jnp.float32),
            grid_spec=pltpu.PrefetchScalarGridSpec(
                num_scalar_prefetch=0,
                grid=(nb,),
                in_specs=[
                    pl.BlockSpec((tm, LANES), lambda i: (i, 0)),
                    pl.BlockSpec((tm, LANES), lambda i: (i, 0)),
                ],
                out_specs=pl.BlockSpec((1, 2, LANES), lambda i: (i, 0, 0)),
            ),
            compiler_params=pltpu.CompilerParams(
                # No carried state -> grid axis is truly parallel (v7x megacore).
                dimension_semantics=("parallel",),
                vmem_limit_bytes=VMEM_LIMIT_BYTES,
            ),
            cost_estimate=cost,
        )(x2, t2)

        sums = jnp.sum(partials, axis=(0, 2))  # (2,)
        inter = sums[0]
        total = sums[1]

    if rem:
        # <128-element remainder: negligible, handled in plain JAX (avoids a
        # full-array pad copy of both operands).
        xs = jax.nn.sigmoid(x[n_main:].astype(jnp.float32))
        ts = t[n_main:].astype(jnp.float32)
        inter = inter + jnp.sum(xs * ts)
        total = total + jnp.sum(xs) + jnp.sum(ts)

    smooth = jnp.float32(smooth)
    union = total - inter
    return (2.0 * inter + smooth) / (union + smooth)


def dice_score_ref(inputs, targets, smooth=1.0):
    s = jax.nn.sigmoid(inputs.astype(jnp.float32)).reshape(-1)
    t = targets.astype(jnp.float32).reshape(-1)
    inter = jnp.sum(s * t)
    total = jnp.sum(s) + jnp.sum(t)
    union = total - inter
    return (2.0 * inter + smooth) / (union + smooth)


if __name__ == "__main__":
    key = jax.random.PRNGKey(0)
    k1, k2, k3, k4, k5, k6 = jax.random.split(key, 6)

    # NCHW-shaped logits and binary targets, as the PyTorch module expects.
    x = jax.random.normal(k1, (2, 4, 16, 16), dtype=jnp.float32)
    t = (jax.random.uniform(k2, (2, 4, 16, 16)) > 0.5).astype(jnp.float32)
    dice = jax.block_until_ready(dice_score(x, t, smooth=1.0))
    ref = jax.block_until_ready(dice_score_ref(x, t, smooth=1.0))
    assert jnp.allclose(dice, ref, rtol=1e-5, atol=1e-5), (dice, ref)

    # Non-128-aligned flat size -> kernel on aligned prefix + JAX tail.
    x_odd = jax.random.normal(k3, (3, 5, 37, 23), dtype=jnp.float32)
    t_odd = (jax.random.uniform(k4, (3, 5, 37, 23)) > 0.5).astype(jnp.float32)
    dice_odd = jax.block_until_ready(dice_score(x_odd, t_odd, smooth=1.0))
    ref_odd = jax.block_until_ready(dice_score_ref(x_odd, t_odd, smooth=1.0))
    assert jnp.allclose(dice_odd, ref_odd, rtol=1e-5, atol=1e-5), (dice_odd, ref_odd)

    # Multi-block grid (even block count) with masked partial last block.
    x_mb = jax.random.normal(k5, (2, 5, 110, 128), dtype=jnp.float32)
    t_mb = (jax.random.uniform(k6, (2, 5, 110, 128)) > 0.5).astype(jnp.float32)
    dice_mb = jax.block_until_ready(dice_score(x_mb, t_mb, smooth=1.0))
    ref_mb = jax.block_until_ready(dice_score_ref(x_mb, t_mb, smooth=1.0))
    assert jnp.allclose(dice_mb, ref_mb, rtol=1e-4, atol=1e-5), (dice_mb, ref_mb)

    print("KERNEL_OK")
</pallas_src>

<mosaic_0001>
module attributes {stable_mosaic.version = 11 : i64} {
  func.func @_dice_partial_kernel(%arg0: i32, %arg1: memref<16x128xf32, #tpu.memory_space<vmem>>, %arg2: memref<16x128xf32, #tpu.memory_space<vmem>>, %arg3: memref<1x2x128xf32, #tpu.memory_space<vmem>>) attributes {dimension_semantics = [#tpu.dimension_semantics<parallel>], iteration_bounds = array<i64: 1>, scalar_prefetch = 0 : i64, scratch_operands = 0 : i64, tpu.core_type = #tpu.core_type<tc>, window_params = [{transform_indices = @transform_0, window_bounds = array<i64: 16, 128>}, {transform_indices = @transform_1, window_bounds = array<i64: 16, 128>}, {transform_indices = @transform_2, window_bounds = array<i64: 1, 2, 128>}]} {
    %c0 = arith.constant 0 : index
    %c0_0 = arith.constant 0 : index
    %0 = vector.load %arg1[%c0, %c0_0] : memref<16x128xf32, #tpu.memory_space<vmem>>, vector<16x128xf32>
    %c0_1 = arith.constant 0 : index
    %c0_2 = arith.constant 0 : index
    %1 = vector.load %arg2[%c0_1, %c0_2] : memref<16x128xf32, #tpu.memory_space<vmem>>, vector<16x128xf32>
    %2 = arith.negf %0 : vector<16x128xf32>
    %3 = math.exp %2 : vector<16x128xf32>
    %cst = arith.constant 1.000000e+00 : f32
    %4 = vector.broadcast %cst : f32 to vector<16x128xf32>
    %5 = arith.addf %4, %3 : vector<16x128xf32>
    %6 = arith.divf %4, %5 : vector<16x128xf32>
    %7 = arith.mulf %6, %1 : vector<16x128xf32>
    %cst_3 = arith.constant dense<0.000000e+00> : vector<128xf32>
    %8 = vector.multi_reduction <add>, %7, %cst_3 [0] : vector<16x128xf32> to vector<128xf32>
    %9 = vector.shape_cast %8 : vector<128xf32> to vector<1x128xf32>
    %cst_4 = arith.constant dense<0.000000e+00> : vector<128xf32>
    %10 = vector.multi_reduction <add>, %6, %cst_4 [0] : vector<16x128xf32> to vector<128xf32>
    %11 = vector.shape_cast %10 : vector<128xf32> to vector<1x128xf32>
    %cst_5 = arith.constant dense<0.000000e+00> : vector<128xf32>
    %12 = vector.multi_reduction <add>, %1, %cst_5 [0] : vector<16x128xf32> to vector<128xf32>
    %13 = vector.shape_cast %12 : vector<128xf32> to vector<1x128xf32>
    %14 = arith.addf %11, %13 : vector<1x128xf32>
    %c0_6 = arith.constant 0 : index
    %c0_7 = arith.constant 0 : index
    %c0_8 = arith.constant 0 : index
    %15 = vector.load %arg3[%c0_6, %c0_7, %c0_8] : memref<1x2x128xf32, #tpu.memory_space<vmem>>, vector<1x1x128xf32>
    %16 = vector.shape_cast %15 : vector<1x1x128xf32> to vector<1x128xf32>
    %17 = vector.shape_cast %9 : vector<1x128xf32> to vector<1x1x128xf32>
    tpu.vector_store %arg3[%c0_6, %c0_7, %c0_8], %17 {strides = array<i32>} : memref<1x2x128xf32, #tpu.memory_space<vmem>>, vector<1x1x128xf32>,
    %c0_9 = arith.constant 0 : index
    %c1 = arith.constant 1 : index
    %c0_10 = arith.constant 0 : index
    %18 = vector.load %arg3[%c0_9, %c1, %c0_10] : memref<1x2x128xf32, #tpu.memory_space<vmem>>, vector<1x1x128xf32>
    %19 = vector.shape_cast %18 : vector<1x1x128xf32> to vector<1x128xf32>
    %20 = vector.shape_cast %14 : vector<1x128xf32> to vector<1x1x128xf32>
    tpu.vector_store %arg3[%c0_9, %c1, %c0_10], %20 {strides = array<i32>} : memref<1x2x128xf32, #tpu.memory_space<vmem>>, vector<1x1x128xf32>,
    return
  }
  func.func @transform_0(%arg0: i32) -> (i32, i32) {
    %c0_i32 = arith.constant 0 : i32
    %c0_i32_0 = arith.constant 0 : i32
    return %arg0, %c0_i32 : i32, i32
  }
  func.func @transform_1(%arg0: i32) -> (i32, i32) {
    %c0_i32 = arith.constant 0 : i32
    %c0_i32_0 = arith.constant 0 : i32
    return %arg0, %c0_i32 : i32, i32
  }
  func.func @transform_2(%arg0: i32) -> (i32, i32, i32) {
    %c0_i32 = arith.constant 0 : i32
    %c0_i32_0 = arith.constant 0 : i32
    %c0_i32_1 = arith.constant 0 : i32
    return %arg0, %c0_i32, %c0_i32_0 : i32, i32, i32
  }
}

</mosaic_0001>

<bundles_post_ra>
// kernel: tpu_custom_call.1
= control target key start
LH: loop header
LB: loop body
LE: loop exit
PB: predicated region body
PF: predicated region fallthrough
CT: control target
= control target key end

     0   :  { %7 = vsyncpa [#allocation3], 0  ;;  %s208_s0 = inlined_call_operand.hbm [shape: f32[16,128], index: 0, kind: input, shape index: {}]   ;;  %s209_s1 = inlined_call_operand.hbm [shape: f32[16,128], index: 1, kind: input, shape index: {}]   ;;  %s210_s2 = inlined_call_operand.hbm [shape: f32[1,2,128], index: 2, kind: output, shape index: {}]  }
   0x1   :  { %8 = vsyncpa [#allocation6], 0 }
   0x2   :  { %9 = vsyncpa [#allocation4], 0  ;;  %s179_s9 = smov [#allocation2]  }
   0x3   :  { %s15_s10 = sshll.u32 %s179_s9, 4  ;;  %s16_s10 = int_to_ptr.vmem [resolvable:$true] %s15_s10 }
   0x4   :  { %s121_s11 = scalar_lea.vmem %s16_s10, 256  ;;  %p126_p1 = scmp.lt.s32.totalorder %s16_s10, %s16_s10 }
   0x5   :  { %p122_p0 = scmp.ne.s32.totalorder %s16_s10, %s121_s11  ;;  %p127_p2 = scmp.lt.s32.totalorder %s121_s11, %s121_s11 }
   0x7   :  { %p128_p3 = por %p127_p2, %p126_p1 }
   0x9   :  { %p129_p4 = pnand %p128_p3, %p122_p0 }
   0xb   :  { %132 = shalt.err (!%p129_p4)
}
   0xc   :  { %s180_s12 = smov 128   ;;  %s181_s13 = smov 8  }
   0xd   :  { %21 = dma.hbm_to_vmem [thread:$0]  %s208_s0, 256, %s16_s10, [#allocation3], %s180_s12, %s180_s12, %s181_s13  }
   0xe   :  { %s182_s16 = smov [#allocation5]  }
   0xf   :  { %s27_s17 = sshll.u32 %s182_s16, 4  ;;  %s28_s17 = int_to_ptr.vmem [resolvable:$true] %s27_s17 }
  0x10   :  { %s141_s18 = scalar_lea.vmem %s28_s17, 256  ;;  %p146_p6 = scmp.lt.s32.totalorder %s28_s17, %s28_s17 }
  0x11   :  { %p142_p5 = scmp.ne.s32.totalorder %s28_s17, %s141_s18  ;;  %p147_p7 = scmp.lt.s32.totalorder %s141_s18, %s141_s18 }
  0x13   :  { %p148_p8 = por %p147_p7, %p146_p6 }
  0x15   :  { %p149_p9 = pnand %p148_p8, %p142_p5 }
  0x17   :  { %152 = shalt.err (!%p149_p9)
}
  0x18   :  { %33 = dma.hbm_to_vmem [thread:$0]  %s209_s1, 256, %s28_s17, [#allocation6], %s180_s12, %s180_s12, %s181_s13  }
  0x19   :  { %173 = dma.done.wait [#allocation3], 256  }
  0x1a   :  { %174 = vsyncadd [#allocation3], 4294967040 }
  0x1b   :  { %175 = dma.done.wait [#allocation6], 256  }
  0x1c   :  { %176 = vsyncadd [#allocation6], 4294967040  ;;  %v40_v0 = vld [vmem:[#allocation2] sm:$0xff]  ;;  %v41_v1 = vld [vmem:[#allocation2 + $0x8] sm:$0xff]  ;;  %s183_s0 = smov [#allocation7]  }
  0x1d   :  { %v98_v2 = vmul.f32 -1.442695, %v40_v0  ;;  %v99_v3 = vmul.f32 -1.442695, %v41_v1  ;;  %v42_v6 = vld [vmem:[#allocation5] sm:$0xff]  ;;  %v43_v7 = vld [vmem:[#allocation5 + $0x8] sm:$0xff] }
  0x1e   :  { %v72_v10 = vadd.f32 %v43_v7, %v42_v6  ;;  %s88_s1 = sshll.u32 %s183_s0, 4  ;;  %s89_s1 = int_to_ptr.vmem [resolvable:$true] %s88_s1 }
  0x1f   :  { %105 = vpow2.f32 %v98_v2  ;;  %s153_s21 = scalar_lea.vmem %s89_s1, 32  ;;  %p158_p11 = scmp.lt.s32.totalorder %s89_s1, %s89_s1 }
  0x20   :  { %107 = vpow2.f32 %v99_v3  ;;  %v73_v11 = vrot.slane %v72_v10, 4  ;;  %p154_p10 = scmp.ne.s32.totalorder %s89_s1, %s153_s21  ;;  %p159_p12 = scmp.lt.s32.totalorder %s153_s21, %s153_s21 }
  0x22   :  { %v74_v12 = vadd.f32 %v73_v11, %v72_v10  ;;  %p160_p13 = por %p159_p12, %p158_p11 }
  0x24   :  { %v75_v14 = vrot.slane %v74_v12, 2  ;;  %p161_p0 = pnand %p160_p13, %p154_p10 }
  0x26   :  { %v76_v21 = vadd.f32 %v75_v14, %v74_v12 }
  0x28   :  { %v77_v26 = vrot.slane %v76_v21, 1 }
  0x2a   :  { %v78_v31 = vadd.f32 %v77_v26, %v76_v21 }
  0x2c   :  { %v106_v4 = vpop.eup %105 }
  0x2d   :  { %v108_v5 = vpop.eup %107  ;;  %v50_v8 = vadd.f32 1.0, %v106_v4 }
  0x2e   :  { %v51_v9 = vadd.f32 1.0, %v108_v5 }
  0x2f   :  { %109 = vrcp.f32 %v50_v8 }
  0x30   :  { %111 = vrcp.f32 %v51_v9 }
  0x3c   :  { %v110_v13 = vpop.eup %109 }
  0x3d   :  { %v112_v15 = vpop.eup %111  ;;  %v56_v16 = vmul.f32 %v110_v13, %v42_v6 }
  0x3e   :  { %v57_v17 = vmul.f32 %v112_v15, %v43_v7  ;;  %v65_v18 = vadd.f32 %v112_v15, %v110_v13 }
  0x40   :  { %v58_v19 = vadd.f32 %v57_v17, %v56_v16  ;;  %v66_v20 = vrot.slane %v65_v18, 4 }
  0x42   :  { %v59_v22 = vrot.slane %v58_v19, 4  ;;  %v67_v23 = vadd.f32 %v66_v20, %v65_v18 }
  0x44   :  { %v60_v24 = vadd.f32 %v59_v22, %v58_v19  ;;  %v68_v25 = vrot.slane %v67_v23, 2 }
  0x46   :  { %v61_v27 = vrot.slane %v60_v24, 2  ;;  %v69_v28 = vadd.f32 %v68_v25, %v67_v23 }
  0x48   :  { %v62_v29 = vadd.f32 %v61_v27, %v60_v24  ;;  %v70_v30 = vrot.slane %v69_v28, 1 }
  0x4a   :  { %v63_v32 = vrot.slane %v62_v29, 1  ;;  %v71_v33 = vadd.f32 %v70_v30, %v69_v28 }
  0x4c   :  { %v64_v34 = vadd.f32 %v63_v32, %v62_v29  ;;  %v79_v35 = vadd.f32 %v78_v31, %v71_v33 }
  0x4e   :  { %80 = vst [vmem:[#allocation7] sm:$0x1] %v64_v34  ;;  %81 = vst [vmem:[#allocation7 + $0x1] sm:$0x1] %v79_v35 }
  0x4f   :  { %164 = shalt.err (!%p161_p0)
}
  0x50   :  { %91 = dma.vmem_to_hbm [thread:$0]  %s89_s1, 32, %s210_s2, [#allocation4]  }
  0x51   :  { %177 = dma.done.wait [#allocation4], 32  }
  0x52   :  { %178 = vsyncadd [#allocation4], 4294967264 }
  0x53   :  { %95 = vsyncpa [#allocation3], 1 }
  0x54   :  { %96 = vsyncpa [#allocation6], 1 }
  0x55   :  { %97 = vsyncpa [#allocation4], 1 }

</bundles_post_ra>
